<compile_context>
chip_gen: v6e
topology: v6e:2x2x1
jax: 0.10.0
libtpu: 0.0.40
codegen_flags: <defaults>
</compile_context>

<pallas_src>
import jax
import jax.numpy as jnp
from jax.experimental import pallas as pl
from jax.experimental.pallas import tpu as pltpu


# ----------------------------------------------------------------------------
# Packed bf16 parameter slab (224, 64). Rows are 16-aligned (bf16 sublane
# packing) so in-kernel slices are clean:
#   rows   0:  4  fc1 weight  (4, 64)                      (rows 4:16 zero)
#   rows  16: 80  fc2 weight  (64, 64)
#   rows  80:144  [fcv1 | fca1] fused head-hidden weight   (64, 64)
#   rows 144:208  block-diagonal head-output weight        (64, 64):
#                   [:32, 0:1] = fcv2, [32:, 1:3] = fca2
#   row  208      fc1 bias
#   row  209      fc2 bias
#   row  210      [fcv1 bias | fca1 bias]
#   row  211      [fcv2 bias, fca2 bias, 0...]
#   rows 212:224  zero padding
# ----------------------------------------------------------------------------


def dueling_dqn_kernel(x_ref, w_ref, out_ref):
    x = x_ref[...].astype(jnp.bfloat16)              # (TB, 4)

    w1 = w_ref[0:4, :]                               # (4, 64)   bf16
    w2 = w_ref[16:80, :]                             # (64, 64)  bf16
    wh = w_ref[80:144, :]                            # (64, 64)  bf16 fused head hidden
    wo = w_ref[144:208, :]                           # (64, 64)  bf16 block-diag head out
    b = w_ref[208:212, :].astype(jnp.float32)        # (4, 64)   biases, f32

    # --- fc1: single K=4 MXU push, f32 accumulation ---------------------------
    h = jnp.dot(x, w1, preferred_element_type=jnp.float32) + b[0:1, :]
    h = jnp.maximum(h, 0.0)                          # (TB, 64) f32

    # --- fc2 -------------------------------------------------------------------
    h = jnp.dot(h.astype(jnp.bfloat16), w2,
                preferred_element_type=jnp.float32) + b[1:2, :]
    h = jnp.maximum(h, 0.0)                          # (TB, 64) f32

    # --- fused head hidden: [relu(fcv1(h)) | relu(fca1(h))] --------------------
    hh = jnp.dot(h.astype(jnp.bfloat16), wh,
                 preferred_element_type=jnp.float32) + b[2:3, :]
    hh = jnp.maximum(hh, 0.0)                        # (TB, 64) f32

    # --- fused head output (block diagonal): col 0 = V, cols 1:3 = A -----------
    o = jnp.dot(hh.astype(jnp.bfloat16), wo,
                preferred_element_type=jnp.float32) + b[3:4, :]
    v = o[:, 0:1]                                    # (TB, 1)
    a = o[:, 1:3]                                    # (TB, 2)

    # --- dueling combination: Q = V - max_a(A) + A -----------------------------
    a_max = jnp.max(a, axis=1, keepdims=True)        # (TB, 1)
    out_ref[...] = (v - a_max + a).astype(out_ref.dtype)


def pack_params(p):
    """Pack all layer weights + biases into ONE bf16 slab (224, 64). Run once at init."""
    w = jnp.zeros((224, 64), jnp.float32)
    w = w.at[0:4, :].set(p["w1"])
    w = w.at[16:80, :].set(p["w2"])
    w = w.at[80:144, :].set(jnp.concatenate([p["wv1"], p["wa1"]], axis=1))
    wo = jnp.zeros((64, 64), jnp.float32)
    wo = wo.at[0:32, 0:1].set(p["wv2"])
    wo = wo.at[32:64, 1:3].set(p["wa2"])
    w = w.at[144:208, :].set(wo)
    w = w.at[208:209, :].set(p["b1"])
    w = w.at[209:210, :].set(p["b2"])
    w = w.at[210:211, :].set(jnp.concatenate([p["bv1"], p["ba1"]], axis=1))
    w = w.at[211:212, 0:1].set(p["bv2"])
    w = w.at[211:212, 1:3].set(p["ba2"])
    return w.astype(jnp.bfloat16)


def _round_up(v, m):
    return ((v + m - 1) // m) * m


def dueling_dqn_forward(x, w_slab, *, batch_tile=1024):
    """x: (B, 4) float32 observations. w_slab: packed (224, 64) bf16 params."""
    B = x.shape[0]
    # Batch tile: multiple of 8 rows (f32 sublane). Large default (amortizes
    # per-grid-step overhead) but capped at ceil(B/2) so the grid has >= 2
    # steps whenever the batch allows it (megacore split on v7x).
    tb = _round_up(max(1, min(batch_tile, B)), 8)
    tb = min(tb, max(8, _round_up(pl.cdiv(B, 2), 8)))
    grid = (pl.cdiv(B, tb),)   # partial last block handled by Pallas (no host pad)

    return pl.pallas_call(
        dueling_dqn_kernel,
        out_shape=jax.ShapeDtypeStruct((B, 2), jnp.float32),
        grid_spec=pltpu.PrefetchScalarGridSpec(
            num_scalar_prefetch=0,
            grid=grid,
            in_specs=[
                pl.BlockSpec((tb, 4), lambda i: (i, 0)),      # x: batch-tiled
                pl.BlockSpec((224, 64), lambda i: (0, 0)),    # params: VMEM-resident
            ],
            out_specs=pl.BlockSpec((tb, 2), lambda i: (i, 0)),
        ),
        compiler_params=pltpu.CompilerParams(
            dimension_semantics=("parallel",),                # shards across v7x's 2 TCs
            vmem_limit_bytes=32 * 1024 * 1024,                # headroom on v5e (16 MiB default)
        ),
    )(x, w_slab)


def make_dueling_dqn_forward(params, *, batch_tile=1024):
    """Pack parameters ONCE at init and return a jitted forward closure."""
    w_slab = pack_params(params)

    @jax.jit
    def forward(x):
        return dueling_dqn_forward(x, w_slab, batch_tile=batch_tile)

    return forward


def init_params(key):
    """Deterministic synthetic init matching nn.Linear shapes (stored (in, out))."""
    def linear(key, fan_in, fan_out):
        kw, kb = jax.random.split(key)
        bound = 1.0 / jnp.sqrt(fan_in)
        w = jax.random.uniform(kw, (fan_in, fan_out), jnp.float32, -bound, bound)
        b = jax.random.uniform(kb, (1, fan_out), jnp.float32, -bound, bound)
        return w, b

    keys = jax.random.split(key, 6)
    params = {}
    params["w1"],  params["b1"]  = linear(keys[0], 4, 64)    # fc1
    params["w2"],  params["b2"]  = linear(keys[1], 64, 64)   # fc2
    params["wv1"], params["bv1"] = linear(keys[2], 64, 32)   # fcv1
    params["wv2"], params["bv2"] = linear(keys[3], 32, 1)    # fcv2
    params["wa1"], params["ba1"] = linear(keys[4], 64, 32)   # fca1
    params["wa2"], params["ba2"] = linear(keys[5], 32, 2)    # fca2
    return params


def reference_forward(x, p):
    """Pure-JAX reference (PyTorch forward() semantics), with weights quantized
    to bf16 to match the kernel's stored parameter precision."""
    q = lambda t: t.astype(jnp.bfloat16).astype(jnp.float32)
    h = jnp.maximum(x @ q(p["w1"]) + q(p["b1"]), 0.0)
    h = jnp.maximum(h @ q(p["w2"]) + q(p["b2"]), 0.0)
    v = jnp.maximum(h @ q(p["wv1"]) + q(p["bv1"]), 0.0) @ q(p["wv2"]) + q(p["bv2"])
    a = jnp.maximum(h @ q(p["wa1"]) + q(p["ba1"]), 0.0) @ q(p["wa2"]) + q(p["ba2"])
    return v - jnp.max(a, axis=1, keepdims=True) + a


# TODO(synk): get_action / update / optimizer are host-side training logic
# (epsilon-greedy sampling, Adam, replay buffer) and are not part of the
# forward pass; only forward() is implemented as a kernel.

if __name__ == "__main__":
    key = jax.random.PRNGKey(0)
    k_params, k_x1, k_x2 = jax.random.split(key, 3)

    params = init_params(k_params)
    forward = make_dueling_dqn_forward(params)   # params packed once, here

    # forward() reshapes obs to (-1, 4); use batch=8 observations of dim 4.
    x = jax.random.normal(k_x1, (8, 4), dtype=jnp.float32)
    q1 = jax.block_until_ready(forward(x))
    q1_ref = reference_forward(x, params)
    assert q1.shape == (8, 2), q1.shape
    assert jnp.allclose(q1, q1_ref, atol=2e-2, rtol=2e-2), (q1, q1_ref)

    # Larger, non-tile-multiple batch: exercises the multi-step parallel grid
    # and the clipped partial last block (no host-side padding).
    x2 = jax.random.normal(k_x2, (300, 4), dtype=jnp.float32)
    q2 = jax.block_until_ready(forward(x2))
    q2_ref = reference_forward(x2, params)
    assert q2.shape == (300, 2), q2.shape
    assert jnp.allclose(q2, q2_ref, atol=2e-2, rtol=2e-2)

    print("KERNEL_OK")
</pallas_src>

<mosaic_0001>
module attributes {stable_mosaic.version = 11 : i64} {
  func.func @dueling_dqn_kernel(%arg0: i32, %arg1: memref<8x4xf32, #tpu.memory_space<vmem>>, %arg2: memref<224x64xbf16, #tpu.memory_space<vmem>>, %arg3: memref<8x2xf32, #tpu.memory_space<vmem>>) attributes {dimension_semantics = [#tpu.dimension_semantics<parallel>], iteration_bounds = array<i64: 1>, scalar_prefetch = 0 : i64, scratch_operands = 0 : i64, tpu.core_type = #tpu.core_type<tc>, window_params = [{transform_indices = @transform_0, window_bounds = array<i64: 8, 4>}, {pipeline_mode = #tpu.pipeline_mode<synchronous>, transform_indices = @transform_1, window_bounds = array<i64: 224, 64>}, {transform_indices = @transform_2, window_bounds = array<i64: 8, 2>}]} {
    %c0 = arith.constant 0 : index
    %c0_0 = arith.constant 0 : index
    %0 = vector.load %arg1[%c0, %c0_0] : memref<8x4xf32, #tpu.memory_space<vmem>>, vector<8x4xf32>
    %1 = arith.truncf %0 : vector<8x4xf32> to vector<8x4xbf16>
    %c0_1 = arith.constant 0 : index
    %c0_2 = arith.constant 0 : index
    %2 = vector.load %arg2[%c0_1, %c0_2] : memref<224x64xbf16, #tpu.memory_space<vmem>>, vector<4x64xbf16>
    %c16 = arith.constant 16 : index
    %c0_3 = arith.constant 0 : index
    %3 = vector.load %arg2[%c16, %c0_3] : memref<224x64xbf16, #tpu.memory_space<vmem>>, vector<64x64xbf16>
    %c80 = arith.constant 80 : index
    %c0_4 = arith.constant 0 : index
    %4 = vector.load %arg2[%c80, %c0_4] : memref<224x64xbf16, #tpu.memory_space<vmem>>, vector<64x64xbf16>
    %c144 = arith.constant 144 : index
    %c0_5 = arith.constant 0 : index
    %5 = vector.load %arg2[%c144, %c0_5] : memref<224x64xbf16, #tpu.memory_space<vmem>>, vector<64x64xbf16>
    %c208 = arith.constant 208 : index
    %c0_6 = arith.constant 0 : index
    %6 = vector.load %arg2[%c208, %c0_6] : memref<224x64xbf16, #tpu.memory_space<vmem>>, vector<4x64xbf16>
    %7 = arith.extf %6 : vector<4x64xbf16> to vector<4x64xf32>
    %cst = arith.constant dense<0.000000e+00> : vector<8x64xf32>
    %8 = tpu.matmul %1, %2, %cst {dimension_numbers = #tpu.dot_dimension_numbers<[1], [0], [0], [1], [0, 0, 1, 1], [], []>} : vector<8x4xbf16>, vector<4x64xbf16>, vector<8x64xf32> -> vector<8x64xf32>
    %9 = vector.extract_strided_slice %7 {offsets = [0, 0], sizes = [1, 64], strides = [1, 1]} : vector<4x64xf32> to vector<1x64xf32>
    %10 = vector.broadcast %9 : vector<1x64xf32> to vector<8x64xf32>
    %11 = arith.addf %8, %10 : vector<8x64xf32>
    %cst_7 = arith.constant 0.000000e+00 : f32
    %12 = vector.broadcast %cst_7 : f32 to vector<8x64xf32>
    %13 = arith.maximumf %11, %12 : vector<8x64xf32>
    %14 = arith.truncf %13 : vector<8x64xf32> to vector<8x64xbf16>
    %cst_8 = arith.constant dense<0.000000e+00> : vector<8x64xf32>
    %15 = tpu.matmul %14, %3, %cst_8 {dimension_numbers = #tpu.dot_dimension_numbers<[1], [0], [0], [1], [0, 0, 1, 1], [], []>} : vector<8x64xbf16>, vector<64x64xbf16>, vector<8x64xf32> -> vector<8x64xf32>
    %16 = vector.extract_strided_slice %7 {offsets = [1, 0], sizes = [1, 64], strides = [1, 1]} : vector<4x64xf32> to vector<1x64xf32>
    %17 = vector.broadcast %16 : vector<1x64xf32> to vector<8x64xf32>
    %18 = arith.addf %15, %17 : vector<8x64xf32>
    %cst_9 = arith.constant 0.000000e+00 : f32
    %19 = vector.broadcast %cst_9 : f32 to vector<8x64xf32>
    %20 = arith.maximumf %18, %19 : vector<8x64xf32>
    %21 = arith.truncf %20 : vector<8x64xf32> to vector<8x64xbf16>
    %cst_10 = arith.constant dense<0.000000e+00> : vector<8x64xf32>
    %22 = tpu.matmul %21, %4, %cst_10 {dimension_numbers = #tpu.dot_dimension_numbers<[1], [0], [0], [1], [0, 0, 1, 1], [], []>} : vector<8x64xbf16>, vector<64x64xbf16>, vector<8x64xf32> -> vector<8x64xf32>
    %23 = vector.extract_strided_slice %7 {offsets = [2, 0], sizes = [1, 64], strides = [1, 1]} : vector<4x64xf32> to vector<1x64xf32>
    %24 = vector.broadcast %23 : vector<1x64xf32> to vector<8x64xf32>
    %25 = arith.addf %22, %24 : vector<8x64xf32>
    %cst_11 = arith.constant 0.000000e+00 : f32
    %26 = vector.broadcast %cst_11 : f32 to vector<8x64xf32>
    %27 = arith.maximumf %25, %26 : vector<8x64xf32>
    %28 = arith.truncf %27 : vector<8x64xf32> to vector<8x64xbf16>
    %cst_12 = arith.constant dense<0.000000e+00> : vector<8x64xf32>
    %29 = tpu.matmul %28, %5, %cst_12 {dimension_numbers = #tpu.dot_dimension_numbers<[1], [0], [0], [1], [0, 0, 1, 1], [], []>} : vector<8x64xbf16>, vector<64x64xbf16>, vector<8x64xf32> -> vector<8x64xf32>
    %30 = vector.extract_strided_slice %7 {offsets = [3, 0], sizes = [1, 64], strides = [1, 1]} : vector<4x64xf32> to vector<1x64xf32>
    %31 = vector.broadcast %30 : vector<1x64xf32> to vector<8x64xf32>
    %32 = arith.addf %29, %31 : vector<8x64xf32>
    %33 = vector.extract_strided_slice %32 {offsets = [0, 0], sizes = [8, 1], strides = [1, 1]} : vector<8x64xf32> to vector<8x1xf32>
    %34 = vector.extract_strided_slice %32 {offsets = [0, 1], sizes = [8, 2], strides = [1, 1]} : vector<8x64xf32> to vector<8x2xf32>
    %cst_13 = arith.constant dense<0xFF800000> : vector<8xf32>
    %35 = vector.multi_reduction <maximumf>, %34, %cst_13 [1] : vector<8x2xf32> to vector<8xf32>
    %36 = vector.shape_cast %35 : vector<8xf32> to vector<8x1xf32>
    %37 = arith.subf %33, %36 : vector<8x1xf32>
    %38 = vector.broadcast %37 : vector<8x1xf32> to vector<8x2xf32>
    %39 = arith.addf %38, %34 : vector<8x2xf32>
    %c0_14 = arith.constant 0 : index
    %c0_15 = arith.constant 0 : index
    %40 = vector.load %arg3[%c0_14, %c0_15] : memref<8x2xf32, #tpu.memory_space<vmem>>, vector<8x2xf32>
    tpu.vector_store %arg3[%c0_14, %c0_15], %39 {strides = array<i32>} : memref<8x2xf32, #tpu.memory_space<vmem>>, vector<8x2xf32>,
    return
  }
  func.func @transform_0(%arg0: i32) -> (i32, i32) {
    %c0_i32 = arith.constant 0 : i32
    %c0_i32_0 = arith.constant 0 : i32
    return %arg0, %c0_i32 : i32, i32
  }
  func.func @transform_1(%arg0: i32) -> (i32, i32) {
    %c0_i32 = arith.constant 0 : i32
    %c0_i32_0 = arith.constant 0 : i32
    %c0_i32_1 = arith.constant 0 : i32
    return %c0_i32, %c0_i32_0 : i32, i32
  }
  func.func @transform_2(%arg0: i32) -> (i32, i32) {
    %c0_i32 = arith.constant 0 : i32
    %c0_i32_0 = arith.constant 0 : i32
    return %arg0, %c0_i32 : i32, i32
  }
}

</mosaic_0001>

<bundles_post_ra>
// kernel: forward.1
= control target key start
LH: loop header
LB: loop body
LE: loop exit
PB: predicated region body
PF: predicated region fallthrough
CT: control target
= control target key end

     0   :  { %7 = vsyncpa [#allocation3], 0  ;;  %s466_s9 = smov [#allocation2]   ;;  %s521_s0 = inlined_call_operand.vmem [shape: f32[8,4], index: 0, kind: input, shape index: {}]   ;;  %s522_s1 = inlined_call_operand.hbm [shape: bf16[224,64], index: 1, kind: input, shape index: {}]   ;;  %s523_s2 = inlined_call_operand.vmem [shape: f32[8,2], index: 2, kind: output, shape index: {}]  }
   0x1   :  { %s15_s10 = sshll.u32 %s466_s9, 4  ;;  %s16_s10 = int_to_ptr.vmem [resolvable:$true] %s15_s10 }
   0x2   :  { %s452_s11 = scalar_lea.vmem %s16_s10, 1792  ;;  %p457_p1 = scmp.lt.s32.totalorder %s16_s10, %s16_s10 }
   0x3   :  { %p453_p0 = scmp.ne.s32.totalorder %s16_s10, %s452_s11  ;;  %p458_p2 = scmp.lt.s32.totalorder %s452_s11, %s452_s11 }
   0x5   :  { %p459_p3 = por %p458_p2, %p457_p1 }
   0x7   :  { %p460_p4 = pnand %p459_p3, %p453_p0 }
   0x9   :  { %463 = shalt.err (!%p460_p4)
}
   0xa   :  { %s467_s12 = smov 64   ;;  %s468_s13 = smov 4  }
   0xb   :  { %21 = dma.hbm_to_vmem [thread:$0]  %s522_s1, 1792, %s16_s10, [#allocation3], %s467_s12, %s467_s12, %s468_s13  }
   0xc   :  { %464 = dma.done.wait [#allocation3], 1792  }
   0xd   :  { %465 = vsyncadd [#allocation3], 4294965504  ;;  %v469_v0 = vmov 0.0   ;;  %vm470_vm0 = vmmov 0   ;;  %vm63_vm1 = vcmask 1041408   ;;  %v26_v2 = vld [vmem:[%s521_s0] sm:$0xff]  ;;  %v55_v11 = vlaneseq }
   0xe   :  { %382 = vmatprep.subr.bf16.mxu0 %v469_v0  ;;  %384 = vmatprep.mubr.msk.bf16.mxu0 %vm470_vm0, %v469_v0  ;;  %v28_v1 = vld [vmem:[#allocation2] sm:$0x3]  ;;  %v27_v4 = vpack.c.bf16 %v26_v2, %v26_v2  ;;  %vm59_vm2 = vcmask 31744   ;;  %v433_v6 = vld [vmem:[#allocation2 + $0x18] sm:$0xff]   ;;  %v434_v7 = vld [vmem:[#allocation2 + $0x10] sm:$0xff]   ;;  %vm137_vm3 = vcmask 523264  }
   0xf   :  { %388 = vmatprep.subr.bf16.mxu1 %v469_v0  ;;  %396 = vmatprep.mubr.msk.bf16.mxu1 %vm470_vm0, %v469_v0  ;;  %v65_v3 = vsel %vm63_vm1, %v28_v1, 0  ;;  %v432_v5 = vld [vmem:[#allocation2 + $0x20] sm:$0xff]   ;;  %v435_v8 = vld [vmem:[#allocation2 + $0x8] sm:$0xff]   ;;  %v437_v10 = vld [vmem:[#allocation2 + $0x38] sm:$0xff]   ;;  %v56_v12 = vshrl.u32 %v55_v11, 7  ;;  %vm327_vm4 = vcmask 23560  }
  0x10   :  { %383 = vmatpush3.bf16.msra.mxu0 %v65_v3  ;;  %389 = vmatpush3.bf16.msra.mxu1 %v432_v5  ;;  %v436_v9 = vld [vmem:[#allocation2 + $0x40] sm:$0xff]   ;;  %v53_v13 = vld [vmem:[#allocation2 + $0x68] sm:$0x3]  ;;  %v438_v24 = vld [vmem:[#allocation2 + $0x30] sm:$0xff]   ;;  %v471_v56 = vmov 0   ;;  %s472_s0 = smov 127  }
  0x11   :  { %400 = vmatprep.subr.bf16.mxu0 %v469_v0  ;;  %390 = vmatprep.subr.bf16.mxu1 %v469_v0  ;;  %v54_v14 = vunpack.c.l.bf16 %v53_v13  ;;  %v57_v15 = vsub.s32 0, %v56_v12  ;;  %v439_v25 = vld [vmem:[#allocation2 + $0x28] sm:$0xff]   ;;  %v440_v26 = vld [vmem:[#allocation2 + $0x60] sm:$0xff]   ;;  %v441_v27 = vld [vmem:[#allocation2 + $0x58] sm:$0xff]   ;;  %v111_v28 = vsub.s32 1, %v56_v12  ;;  %v185_v39 = vsub.s32 2, %v56_v12 }
  0x12   :  { %v442_v37 = vld [vmem:[#allocation2 + $0x50] sm:$0xff]   ;;  %v443_v38 = vld [vmem:[#allocation2 + $0x48] sm:$0xff]   ;;  %v258_v48 = vsub.s32 3, %v56_v12  ;;  %431 = vset.pattern.permute.xlu0 %v471_v56  ;;  %vm342_vm5 = vcmask 15360  }
  0x13   :  { %385 = vmatmul.mubr.msk.bf16.vlgmr.msra.gmra.mxu0 %vm59_vm2, %v27_v4  ;;  %v58_v16 = vrot.slane %v54_v14, %v57_v15  ;;  %v112_v29 = vrot.slane %v54_v14, %v111_v28  ;;  %v186_v40 = vrot.slane %v54_v14, %v185_v39 }
  0x14   :  { %408 = vmatprep.mubr.msk.bf16.mxu0 %vm470_vm0, %v469_v0  ;;  %391 = vmatpush3.bf16.msra.mxu1 %v433_v6  ;;  %v259_v49 = vrot.slane %v54_v14, %v258_v48 }
  0x15   :  { %392 = vmatprep.subr.bf16.mxu1 %v469_v0  ;;  %401 = vmatpush3.bf16.msra.mxu0 %v436_v9 }
  0x16   :  { %402 = vmatprep.subr.bf16.mxu0 %v469_v0 }
  0x18   :  { %393 = vmatpush3.bf16.msra.mxu1 %v434_v7 }
  0x19   :  { %394 = vmatprep.subr.bf16.mxu1 %v469_v0  ;;  %403 = vmatpush3.bf16.msra.mxu0 %v437_v10 }
  0x1a   :  { %404 = vmatprep.subr.bf16.mxu0 %v469_v0 }
  0x1c   :  { %395 = vmatpush3.bf16.msra.mxu1 %v435_v8 }
  0x1d   :  { %412 = vmatprep.subr.bf16.mxu1 %v469_v0  ;;  %405 = vmatpush3.bf16.msra.mxu0 %v438_v24 }
  0x1e   :  { %406 = vmatprep.subr.bf16.mxu0 %v469_v0 }
  0x21   :  { %407 = vmatpush3.bf16.msra.mxu0 %v439_v25 }
  0xd3   :  { %v101_v17 = vpop.f32.mrf.mxu0 }
  0xd4   :  { %v102_v18 = vadd.f32 %v101_v17, %v58_v16 }
  0xd5   :  { %v386_v19 = vpop.f32.mrf.mxu0 }
  0xd6   :  { %v107_v20 = vmax.f32 %v102_v18, 0.0 }
  0xd7   :  { %v104_v21 = vpop.f32.mrf.mxu0 }
  0xd8   :  { %v108_v22 = vpack.c.bf16 %v107_v20, %v107_v20 }
  0xd9   :  { %v387_v23 = vpop.f32.mrf.mxu0 }
  0xda   :  { %397 = vmatmul.mubr.msk.bf16.vlgmr.msra.gmra.mxu1 %vm137_vm3, %v108_v22 }
  0xdb   :  { %420 = vmatprep.mubr.msk.bf16.mxu1 %vm470_vm0, %v469_v0  ;;  %413 = vmatpush3.bf16.msra.mxu1 %v440_v26 }
  0xdc   :  { %414 = vmatprep.subr.bf16.mxu1 %v469_v0 }
  0xdf   :  { %415 = vmatpush3.bf16.msra.mxu1 %v441_v27 }
  0xe0   :  { %416 = vmatprep.subr.bf16.mxu1 %v469_v0 }
  0xe3   :  { %417 = vmatpush3.bf16.msra.mxu1 %v442_v37 }
  0xe4   :  { %418 = vmatprep.subr.bf16.mxu1 %v469_v0 }
  0xe7   :  { %419 = vmatpush3.bf16.msra.mxu1 %v443_v38 }
 0x19a   :  { %v175_v30 = vpop.f32.mrf.mxu1 }
 0x19b   :  { %v176_v31 = vadd.f32 %v175_v30, %v112_v29 }
 0x19c   :  { %v398_v32 = vpop.f32.mrf.mxu1 }
 0x19d   :  { %v181_v33 = vmax.f32 %v176_v31, 0.0 }
 0x19e   :  { %v178_v34 = vpop.f32.mrf.mxu1 }
 0x19f   :  { %v182_v35 = vpack.c.bf16 %v181_v33, %v181_v33 }
 0x1a0   :  { %v399_v36 = vpop.f32.mrf.mxu1 }
 0x1a1   :  { %409 = vmatmul.mubr.msk.bf16.vlgmr.msra.gmra.mxu0 %vm137_vm3, %v182_v35 }
 0x261   :  { %v248_v41 = vpop.f32.mrf.mxu0 }
 0x262   :  { %v249_v42 = vadd.f32 %v248_v41, %v186_v40 }
 0x263   :  { %v410_v43 = vpop.f32.mrf.mxu0 }
 0x264   :  { %v254_v44 = vmax.f32 %v249_v42, 0.0 }
 0x265   :  { %v251_v45 = vpop.f32.mrf.mxu0 }
 0x266   :  { %v255_v46 = vpack.c.bf16 %v254_v44, %v254_v44 }
 0x267   :  { %v411_v47 = vpop.f32.mrf.mxu0 }
 0x268   :  { %421 = vmatmul.mubr.msk.bf16.vlgmr.msra.gmra.mxu1 %vm137_vm3, %v255_v46 }
 0x328   :  { %v321_v50 = vpop.f32.mrf.mxu1 }
 0x329   :  { %v322_v51 = vadd.f32 %v321_v50, %v259_v49 }
 0x32a   :  { %v422_v52 = vpop.f32.mrf.mxu1 }
 0x32b   :  { %v328_v53 = vsel %vm327_vm4, %v322_v51, -inf }
 0x32c   :  { %329 = vmax.xlane.f32.xlu0 %v328_v53  ;;  %v324_v54 = vpop.f32.mrf.mxu1 }
 0x32e   :  { %v423_v55 = vpop.f32.mrf.mxu1 }
 0x3b5   :  { %v330_v57 = vpop.xlane.xlu0 %329 }
 0x3b6   :  { %v331_v58 = vsub.f32 %v322_v51, %v330_v57 }
 0x3b8   :  { %334 = vperm.xlu0 %431, %v331_v58  }
 0x433   :  { %v335_v59 = vpop.permute.xlu0 %334 }
 0x434   :  { %v337_v60 = vadd.f32 %v335_v59, %v322_v51 }
 0x436   :  { %339 = vrot.lane.b32.xlu1 %v337_v60, %s472_s0 }
 0x4a8   :  { %v340_v61 = vpop.permute.xlu1 %339 }
 0x4a9   :  { %343 = vst.msk [vmem:[%s523_s2] sm:$0xff] %vm342_vm5, %v340_v61 }
 0x4aa   :  { %348 = vsyncpa [#allocation3], 1 }

</bundles_post_ra>
